<compile_context>
chip_gen: v7x
topology: tpu7x:2x2x1
jax: 0.10.0
libtpu: 0.0.40
codegen_flags: <defaults>
</compile_context>

<pallas_src>
import math

import jax
import jax.numpy as jnp
from jax.experimental import pallas as pl
from jax.experimental.pallas import tpu as pltpu


def _value_projection_kernel(x_ref, w_ref, o_ref):
    # x_ref: (tile_m, F)   flattened value_input rows
    # w_ref: (F, H*A)      folded value weights (resident across all M tiles)
    # o_ref: (tile_m, H*A) lane-dense output tile in '(bs)(ha)' layout
    o_ref[...] = jnp.dot(
        x_ref[...], w_ref[...], preferred_element_type=jnp.float32
    ).astype(o_ref.dtype)


def _forward_impl(key_input, query_input, value_input, q_w, k_w, v_w):
    del key_input, query_input, q_w, k_w  # algebraically dead in this forward
    B, S, F = value_input.shape
    H, F2, A = v_w.shape
    assert F == F2
    M = B * S
    N = H * A

    # Fold heads into the lane dimension: (H, F, A) -> (F, H*A).  Fused by XLA
    # into the pallas_call prologue under jit.
    w_stacked = jnp.transpose(v_w, (1, 0, 2)).reshape(F, N)
    x_flat = value_input.reshape(M, F)

    # Single full-M block at small sizes; tile M (multiples of 8, K/N kept
    # whole) only when B*S grows.  Grid axis is "parallel" for dual-TC chips.
    tile_m = M if M <= 512 else 512
    grid_m = pl.cdiv(M, tile_m)

    cost = pl.CostEstimate(
        flops=2 * M * F * N,
        transcendentals=0,
        bytes_accessed=4 * (M * F + F * N + M * N),
    )

    out_flat = pl.pallas_call(
        _value_projection_kernel,
        out_shape=jax.ShapeDtypeStruct((M, N), jnp.float32),
        grid_spec=pltpu.PrefetchScalarGridSpec(
            num_scalar_prefetch=0,
            grid=(grid_m,),
            in_specs=[
                pl.BlockSpec((tile_m, F), lambda i: (i, 0)),  # value rows
                pl.BlockSpec((F, N), lambda i: (0, 0)),       # folded v_w (resident)
            ],
            out_specs=pl.BlockSpec((tile_m, N), lambda i: (i, 0)),
        ),
        compiler_params=pltpu.CompilerParams(
            dimension_semantics=("parallel",)),
        cost_estimate=cost,
    )(x_flat, w_stacked)

    # (B*S, H*A) -> (B, S, H, A): free reshape to the torch 'bsha' layout.
    return out_flat.reshape(B, S, H, A)


# Jit the whole wrapper so the weight fold and reshapes are fused into the
# call instead of separate per-invocation XLA ops.
self_attention_forward = jax.jit(_forward_impl)


def self_attention_reference(key_input, query_input, value_input, q_w, k_w, v_w):
    """Pure-JAX transcription of the full PyTorch forward (for validation)."""
    A = q_w.shape[-1]
    keys = jnp.einsum('bsf,hfa->bsha', key_input, k_w)
    queries = jnp.einsum('bsf,hfa->bsha', query_input, q_w)
    values = jnp.einsum('bsf,hfa->bsha', value_input, v_w)
    energy = jnp.einsum('bqha,bkha->bhqk', queries, keys) / jnp.sqrt(jnp.float32(A))
    scores = jax.nn.softmax(energy, axis=2)   # softmax over query axis, as in torch
    return jnp.einsum('bhqs,bsha->bsha', scores, values)


def xavier_uniform(key, shape):
    # PyTorch xavier_uniform on an (H, F, A) tensor: fan_in = F*A, fan_out = H*A.
    H, F, A = shape
    fan_in, fan_out = F * A, H * A
    bound = math.sqrt(6.0 / (fan_in + fan_out))
    return jax.random.uniform(key, shape, jnp.float32, -bound, bound)


if __name__ == "__main__":
    # Small deterministic shapes consistent with the module.
    features_len = 32
    n_heads = 4
    attention_len = 16
    B, S = 2, 8

    root = jax.random.PRNGKey(0)
    k_qw, k_kw, k_vw, k_ki, k_qi, k_vi = jax.random.split(root, 6)

    q_w = xavier_uniform(k_qw, (n_heads, features_len, attention_len))
    k_w = xavier_uniform(k_kw, (n_heads, features_len, attention_len))
    v_w = xavier_uniform(k_vw, (n_heads, features_len, attention_len))
    # TODO(synk): fc_out (Linear(attention_len, features_len)) is unused in
    # the module's forward(), so it is intentionally not applied here.

    key_input = jax.random.normal(k_ki, (B, S, features_len), jnp.float32)
    query_input = jax.random.normal(k_qi, (B, S, features_len), jnp.float32)
    value_input = jax.random.normal(k_vi, (B, S, features_len), jnp.float32)

    out = self_attention_forward(key_input, query_input, value_input, q_w, k_w, v_w)
    out = jax.block_until_ready(out)

    ref = self_attention_reference(key_input, query_input, value_input, q_w, k_w, v_w)
    assert out.shape == (B, S, n_heads, attention_len)
    assert jnp.allclose(out, ref, atol=1e-5, rtol=1e-5), "mismatch vs reference"

    print("KERNEL_OK")
</pallas_src>

<mosaic_0001>
module attributes {stable_mosaic.version = 11 : i64} {
  func.func @_value_projection_kernel(%arg0: i32, %arg1: memref<16x32xf32, #tpu.memory_space<vmem>>, %arg2: memref<32x64xf32, #tpu.memory_space<vmem>>, %arg3: memref<16x64xf32, #tpu.memory_space<vmem>>) attributes {dimension_semantics = [#tpu.dimension_semantics<parallel>], iteration_bounds = array<i64: 1>, scalar_prefetch = 0 : i64, scratch_operands = 0 : i64, tpu.core_type = #tpu.core_type<tc>, window_params = [{transform_indices = @transform_0, window_bounds = array<i64: 16, 32>}, {pipeline_mode = #tpu.pipeline_mode<synchronous>, transform_indices = @transform_1, window_bounds = array<i64: 32, 64>}, {transform_indices = @transform_2, window_bounds = array<i64: 16, 64>}]} {
    %c0 = arith.constant 0 : index
    %c0_0 = arith.constant 0 : index
    %0 = vector.load %arg1[%c0, %c0_0] : memref<16x32xf32, #tpu.memory_space<vmem>>, vector<16x32xf32>
    %c0_1 = arith.constant 0 : index
    %c0_2 = arith.constant 0 : index
    %1 = vector.load %arg2[%c0_1, %c0_2] : memref<32x64xf32, #tpu.memory_space<vmem>>, vector<32x64xf32>
    %cst = arith.constant dense<0.000000e+00> : vector<16x64xf32>
    %2 = tpu.matmul %0, %1, %cst {dimension_numbers = #tpu.dot_dimension_numbers<[1], [0], [0], [1], [0, 0, 1, 1], [], []>} : vector<16x32xf32>, vector<32x64xf32>, vector<16x64xf32> -> vector<16x64xf32>
    %c0_3 = arith.constant 0 : index
    %c0_4 = arith.constant 0 : index
    %3 = vector.load %arg3[%c0_3, %c0_4] : memref<16x64xf32, #tpu.memory_space<vmem>>, vector<16x64xf32>
    tpu.vector_store %arg3[%c0_3, %c0_4], %2 {strides = array<i32>} : memref<16x64xf32, #tpu.memory_space<vmem>>, vector<16x64xf32>,
    return
  }
  func.func @transform_0(%arg0: i32) -> (i32, i32) {
    %c0_i32 = arith.constant 0 : i32
    %c0_i32_0 = arith.constant 0 : i32
    return %arg0, %c0_i32 : i32, i32
  }
  func.func @transform_1(%arg0: i32) -> (i32, i32) {
    %c0_i32 = arith.constant 0 : i32
    %c0_i32_0 = arith.constant 0 : i32
    %c0_i32_1 = arith.constant 0 : i32
    return %c0_i32, %c0_i32_0 : i32, i32
  }
  func.func @transform_2(%arg0: i32) -> (i32, i32) {
    %c0_i32 = arith.constant 0 : i32
    %c0_i32_0 = arith.constant 0 : i32
    return %arg0, %c0_i32 : i32, i32
  }
}

</mosaic_0001>

<bundles_post_ra>
// kernel: _forward_impl.1
= control target key start
LH: loop header
LB: loop body
LE: loop exit
PB: predicated region body
PF: predicated region fallthrough
CT: control target
= control target key end

     0   :  { %vm17_vm0 = vcmask 261120   ;;  %vm99_vm1 = vcmask 523264   ;;  %s172_s1 = inlined_call_operand.vmem [shape: f32[32,64], index: 1, kind: input, shape index: {}]   ;;  %s173_s0 = inlined_call_operand.vmem [shape: f32[16,32], index: 0, kind: input, shape index: {}]   ;;  %s174_s2 = inlined_call_operand.vmem [shape: f32[16,64], index: 2, kind: output, shape index: {}]  }
   0x1   :  { %v13_v0 = vld [vmem:[%s172_s1] sm:$0xff]  ;;  %v14_v1 = vld [vmem:[%s172_s1 + $0x8] sm:$0xff]  ;;  %v15_v2 = vld [vmem:[%s172_s1 + $0x10] sm:$0xff] }
   0x2   :  { %v125_v3 = vpack.c.bf16 %v14_v1, %v13_v0  ;;  %v16_v4 = vld [vmem:[%s172_s1 + $0x18] sm:$0xff]  ;;  %v11_v5 = vld [vmem:[%s173_s0] sm:$0xff]  ;;  %v12_v7 = vld [vmem:[%s173_s0 + $0x8] sm:$0xff] }
   0x3   :  { %v129_v6 = vpack.c.bf16 %v16_v4, %v15_v2  ;;  %122 = vmatprep.mubr.msk.f32.mxu0 %vm17_vm0, %v11_v5 }
   0x4   :  { %126 = vmatprep.subr.bf16.mxu0 %v125_v3 }
   0x5   :  { %128 = vmatpush3.bf16.msra.mxu0 %v125_v3 }
   0x6   :  { %130 = vmatprep.subr.bf16.mxu0 %v129_v6 }
   0x9   :  { %132 = vmatpush3.bf16.msra.mxu0 %v129_v6 }
   0xc   :  { %123 = vmatmul.mubr.msk.f32.vlgmr.msra.gmra.mrb[0].mxu0 %vm17_vm0, %v12_v7 }
  0xdf   :  { %v124_v8 = vpop.f32.mrb[0].mxu0 }
  0xe0   :  { %101 = vst.msk [vmem:[%s174_s2 + $0x8] sm:$0xff] %vm99_vm1, %v124_v8  ;;  %v90_v9 = vpop.f32.mrb[1].mxu0 }
  0xe1   :  { %100 = vst.msk [vmem:[%s174_s2] sm:$0xff] %vm99_vm1, %v90_v9 }

</bundles_post_ra>
